<compile_context>
chip_gen: v6e
topology: v6e:2x2x1
jax: 0.10.0
libtpu: 0.0.40
codegen_flags: <defaults>
</compile_context>

<pallas_src>
import functools

import jax
import jax.numpy as jnp
from jax.experimental import pallas as pl
from jax.experimental.pallas import tpu as pltpu


def _attention_kernel(g_ref, x_ref, wg_ref, bg_ref, wx_ref, bx_ref,
                      wpsi_ref, bpsi_ref, o_ref):
    # g_ref:    (F_g, TM)    pixel tile of gating signal (channels on sublanes)
    # x_ref:    (F_l, TM)    pixel tile of skip features
    # wg_ref:   (F_int, F_g) folded W_g conv+BN weight
    # bg_ref:   (F_int, 1)   folded W_g conv+BN bias
    # wx_ref:   (F_int, F_l) folded W_x conv+BN weight
    # bx_ref:   (F_int, 1)   folded W_x conv+BN bias
    # wpsi_ref: (1, F_int)   folded psi conv+BN weight
    # bpsi_ref: (1, 1)       folded psi conv+BN bias
    # o_ref:    (F_l, TM)
    g = g_ref[...].astype(jnp.float32)
    x = x_ref[...].astype(jnp.float32)

    g1 = jnp.dot(wg_ref[...], g, preferred_element_type=jnp.float32) + bg_ref[...]
    x1 = jnp.dot(wx_ref[...], x, preferred_element_type=jnp.float32) + bx_ref[...]

    s = jnp.maximum(g1 + x1, 0.0)                       # ReLU, (F_int, TM)

    psi_logit = (jnp.dot(wpsi_ref[...], s, preferred_element_type=jnp.float32)
                 + bpsi_ref[...])                       # (1, TM)
    psi = jax.nn.sigmoid(psi_logit)                     # (1, TM), sublane-bcast below

    o_ref[...] = (x * psi * 2.0).astype(o_ref.dtype)


def _fold_conv_bn(w, b, gamma, beta, mean, var, eps=1e-5):
    """Fold 1x1 conv (w: (Cout, Cin), b: (Cout,)) with BN into (w', b')."""
    scale = gamma / jnp.sqrt(var + eps)                 # (Cout,)
    w_f = w * scale[:, None]                            # (Cout, Cin)
    b_f = (b - mean) * scale + beta                     # (Cout,)
    return w_f, b_f


@functools.partial(jax.jit, static_argnames=("tile_hw",))
def attention_block(g, x, params, tile_hw=1024):
    """g: (N, F_g, H, W), x: (N, F_l, H, W)  ->  (N, F_l, H, W)."""
    N, F_g, H, W = g.shape
    _, F_l, _, _ = x.shape
    HW = H * W

    wg, bg = _fold_conv_bn(params["wg"], params["bg"], params["gn_g_gamma"],
                           params["gn_g_beta"], params["gn_g_mean"], params["gn_g_var"])
    wx, bx = _fold_conv_bn(params["wx"], params["bx"], params["gn_x_gamma"],
                           params["gn_x_beta"], params["gn_x_mean"], params["gn_x_var"])
    wp, bp = _fold_conv_bn(params["wpsi"], params["bpsi"], params["gn_p_gamma"],
                           params["gn_p_beta"], params["gn_p_mean"], params["gn_p_var"])
    F_int = wg.shape[0]

    # NCHW viewed as (N, C, H*W): a free reshape, no transpose / no pad.
    g3 = g.reshape(N, F_g, HW)
    x3 = x.reshape(N, F_l, HW)

    # Pixel tile: lane-dense (multiple of 128) unless HW itself is ragged,
    # in which case the full extent is used (always legal as a block dim).
    if HW % 128 == 0:
        tile = min(tile_hw, HW)
    else:
        tile = HW
    grid = (N, pl.cdiv(HW, tile))

    # Weights already in (Cout, Cin) = (F_int, C) orientation for W @ X.
    wg_a = wg.astype(jnp.float32)                    # (F_int, F_g)
    wx_a = wx.astype(jnp.float32)                    # (F_int, F_l)
    wp_a = wp.astype(jnp.float32)                    # (1, F_int)
    bg_c = bg.reshape(F_int, 1).astype(jnp.float32)
    bx_c = bx.reshape(F_int, 1).astype(jnp.float32)
    bp_c = bp.reshape(1, 1).astype(jnp.float32)

    itemsize = jnp.dtype(x.dtype).itemsize
    cost = pl.CostEstimate(
        flops=2 * N * HW * (F_g * F_int + F_l * F_int + F_int),
        transcendentals=N * HW,                      # sigmoid
        bytes_accessed=(g3.size + 2 * x3.size) * itemsize,
    )

    full2d = lambda shape: pl.BlockSpec(shape, lambda n, t: (0, 0))

    out3 = pl.pallas_call(
        _attention_kernel,
        out_shape=jax.ShapeDtypeStruct((N, F_l, HW), x.dtype),
        grid_spec=pltpu.PrefetchScalarGridSpec(
            num_scalar_prefetch=0,
            grid=grid,
            in_specs=[
                pl.BlockSpec((None, F_g, tile), lambda n, t: (n, 0, t)),  # g tile
                pl.BlockSpec((None, F_l, tile), lambda n, t: (n, 0, t)),  # x tile
                full2d((F_int, F_g)),                                     # wg
                full2d((F_int, 1)),                                       # bg
                full2d((F_int, F_l)),                                     # wx
                full2d((F_int, 1)),                                       # bx
                full2d((1, F_int)),                                       # wpsi
                full2d((1, 1)),                                           # bpsi
            ],
            out_specs=pl.BlockSpec((None, F_l, tile), lambda n, t: (n, 0, t)),
        ),
        compiler_params=pltpu.CompilerParams(
            dimension_semantics=("parallel", "parallel")),
        cost_estimate=cost,
    )(g3, x3, wg_a, bg_c, wx_a, bx_c, wp_a, bp_c)

    return out3.reshape(N, F_l, H, W)


def _reference(g, x, params):
    """Plain-JAX reference with identical semantics (for verification)."""
    wg, bg = _fold_conv_bn(params["wg"], params["bg"], params["gn_g_gamma"],
                           params["gn_g_beta"], params["gn_g_mean"], params["gn_g_var"])
    wx, bx = _fold_conv_bn(params["wx"], params["bx"], params["gn_x_gamma"],
                           params["gn_x_beta"], params["gn_x_mean"], params["gn_x_var"])
    wp, bp = _fold_conv_bn(params["wpsi"], params["bpsi"], params["gn_p_gamma"],
                           params["gn_p_beta"], params["gn_p_mean"], params["gn_p_var"])
    hp = jax.lax.Precision.HIGHEST
    g1 = jnp.einsum("nchw,oc->nohw", g, wg, precision=hp) + bg[None, :, None, None]
    x1 = jnp.einsum("nchw,oc->nohw", x, wx, precision=hp) + bx[None, :, None, None]
    s = jnp.maximum(g1 + x1, 0.0)
    psi = jax.nn.sigmoid(
        jnp.einsum("nchw,oc->nohw", s, wp, precision=hp) + bp[None, :, None, None])
    return x * psi * 2.0


def _make_params(key, F_g, F_l, F_int):
    ks = jax.random.split(key, 14)
    p = {
        "wg": 0.1 * jax.random.normal(ks[0], (F_int, F_g), jnp.float32),
        "bg": 0.1 * jax.random.normal(ks[1], (F_int,), jnp.float32),
        "wx": 0.1 * jax.random.normal(ks[2], (F_int, F_l), jnp.float32),
        "bx": 0.1 * jax.random.normal(ks[3], (F_int,), jnp.float32),
        "wpsi": 0.1 * jax.random.normal(ks[4], (1, F_int), jnp.float32),
        "bpsi": 0.1 * jax.random.normal(ks[5], (1,), jnp.float32),
        # BatchNorm params (inference mode): non-trivial values exercise the fold.
        "gn_g_gamma": 1.0 + 0.1 * jax.random.normal(ks[6], (F_int,), jnp.float32),
        "gn_g_beta": 0.1 * jax.random.normal(ks[7], (F_int,), jnp.float32),
        "gn_g_mean": 0.1 * jax.random.normal(ks[8], (F_int,), jnp.float32),
        "gn_g_var": jax.random.uniform(ks[9], (F_int,), jnp.float32, 0.5, 1.5),
        "gn_x_gamma": 1.0 + 0.1 * jax.random.normal(ks[10], (F_int,), jnp.float32),
        "gn_x_beta": 0.1 * jax.random.normal(ks[11], (F_int,), jnp.float32),
        "gn_x_mean": 0.1 * jax.random.normal(ks[12], (F_int,), jnp.float32),
        "gn_x_var": jax.random.uniform(ks[13], (F_int,), jnp.float32, 0.5, 1.5),
        "gn_p_gamma": jnp.ones((1,), jnp.float32),
        "gn_p_beta": jnp.zeros((1,), jnp.float32),
        "gn_p_mean": jnp.zeros((1,), jnp.float32),
        "gn_p_var": jnp.ones((1,), jnp.float32),
    }
    return p


if __name__ == "__main__":
    # Small shapes matching Att1 of Generator4 (F_g=F_l=64, F_int=32).
    N, F_g, F_l, F_int, H, W = 2, 64, 64, 32, 16, 16

    key = jax.random.PRNGKey(0)
    kg, kx, kp = jax.random.split(key, 3)
    g = jax.random.normal(kg, (N, F_g, H, W), jnp.float32)
    x = jax.random.normal(kx, (N, F_l, H, W), jnp.float32)
    params = _make_params(kp, F_g, F_l, F_int)

    out = attention_block(g, x, params)
    out = jax.block_until_ready(out)

    ref = _reference(g, x, params)
    assert out.shape == (N, F_l, H, W)
    assert jnp.allclose(out, ref, atol=5e-3, rtol=5e-3), "mismatch vs reference"

    print("KERNEL_OK")
</pallas_src>

<mosaic_0001>
module attributes {stable_mosaic.version = 11 : i64} {
  func.func @_attention_kernel(%arg0: i32, %arg1: i32, %arg2: memref<1x64x256xf32, #tpu.memory_space<vmem>>, %arg3: memref<1x64x256xf32, #tpu.memory_space<vmem>>, %arg4: memref<32x64xf32, #tpu.memory_space<vmem>>, %arg5: memref<32x1xf32, #tpu.memory_space<vmem>>, %arg6: memref<32x64xf32, #tpu.memory_space<vmem>>, %arg7: memref<32x1xf32, #tpu.memory_space<vmem>>, %arg8: memref<1x32xf32, #tpu.memory_space<vmem>>, %arg9: memref<1x1xf32, #tpu.memory_space<vmem>>, %arg10: memref<1x64x256xf32, #tpu.memory_space<vmem>>) attributes {dimension_semantics = [#tpu.dimension_semantics<parallel>, #tpu.dimension_semantics<parallel>], iteration_bounds = array<i64: 2, 1>, scalar_prefetch = 0 : i64, scratch_operands = 0 : i64, tpu.core_type = #tpu.core_type<tc>, window_params = [{transform_indices = @transform_0, window_bounds = array<i64: 1, 64, 256>}, {transform_indices = @transform_1, window_bounds = array<i64: 1, 64, 256>}, {pipeline_mode = #tpu.pipeline_mode<synchronous>, transform_indices = @transform_2, window_bounds = array<i64: 32, 64>}, {pipeline_mode = #tpu.pipeline_mode<synchronous>, transform_indices = @transform_3, window_bounds = array<i64: 32, 1>}, {pipeline_mode = #tpu.pipeline_mode<synchronous>, transform_indices = @transform_4, window_bounds = array<i64: 32, 64>}, {pipeline_mode = #tpu.pipeline_mode<synchronous>, transform_indices = @transform_5, window_bounds = array<i64: 32, 1>}, {pipeline_mode = #tpu.pipeline_mode<synchronous>, transform_indices = @transform_6, window_bounds = array<i64: 1, 32>}, {pipeline_mode = #tpu.pipeline_mode<synchronous>, transform_indices = @transform_7, window_bounds = array<i64: 1, 1>}, {transform_indices = @transform_8, window_bounds = array<i64: 1, 64, 256>}]} {
    %c0 = arith.constant 0 : index
    %c0_0 = arith.constant 0 : index
    %c0_1 = arith.constant 0 : index
    %0 = vector.load %arg2[%c0, %c0_0, %c0_1] : memref<1x64x256xf32, #tpu.memory_space<vmem>>, vector<1x64x256xf32>
    %1 = vector.shape_cast %0 : vector<1x64x256xf32> to vector<64x256xf32>
    %c0_2 = arith.constant 0 : index
    %c0_3 = arith.constant 0 : index
    %c0_4 = arith.constant 0 : index
    %2 = vector.load %arg3[%c0_2, %c0_3, %c0_4] : memref<1x64x256xf32, #tpu.memory_space<vmem>>, vector<1x64x256xf32>
    %3 = vector.shape_cast %2 : vector<1x64x256xf32> to vector<64x256xf32>
    %c0_5 = arith.constant 0 : index
    %c0_6 = arith.constant 0 : index
    %4 = vector.load %arg4[%c0_5, %c0_6] : memref<32x64xf32, #tpu.memory_space<vmem>>, vector<32x64xf32>
    %cst = arith.constant dense<0.000000e+00> : vector<32x256xf32>
    %5 = tpu.matmul %4, %1, %cst {dimension_numbers = #tpu.dot_dimension_numbers<[1], [0], [0], [1], [0, 0, 1, 1], [], []>} : vector<32x64xf32>, vector<64x256xf32>, vector<32x256xf32> -> vector<32x256xf32>
    %c0_7 = arith.constant 0 : index
    %c0_8 = arith.constant 0 : index
    %6 = vector.load %arg5[%c0_7, %c0_8] : memref<32x1xf32, #tpu.memory_space<vmem>>, vector<32x1xf32>
    %7 = vector.broadcast %6 : vector<32x1xf32> to vector<32x256xf32>
    %8 = arith.addf %5, %7 : vector<32x256xf32>
    %c0_9 = arith.constant 0 : index
    %c0_10 = arith.constant 0 : index
    %9 = vector.load %arg6[%c0_9, %c0_10] : memref<32x64xf32, #tpu.memory_space<vmem>>, vector<32x64xf32>
    %cst_11 = arith.constant dense<0.000000e+00> : vector<32x256xf32>
    %10 = tpu.matmul %9, %3, %cst_11 {dimension_numbers = #tpu.dot_dimension_numbers<[1], [0], [0], [1], [0, 0, 1, 1], [], []>} : vector<32x64xf32>, vector<64x256xf32>, vector<32x256xf32> -> vector<32x256xf32>
    %c0_12 = arith.constant 0 : index
    %c0_13 = arith.constant 0 : index
    %11 = vector.load %arg7[%c0_12, %c0_13] : memref<32x1xf32, #tpu.memory_space<vmem>>, vector<32x1xf32>
    %12 = vector.broadcast %11 : vector<32x1xf32> to vector<32x256xf32>
    %13 = arith.addf %10, %12 : vector<32x256xf32>
    %14 = arith.addf %8, %13 : vector<32x256xf32>
    %cst_14 = arith.constant 0.000000e+00 : f32
    %15 = vector.broadcast %cst_14 : f32 to vector<32x256xf32>
    %16 = arith.maximumf %14, %15 : vector<32x256xf32>
    %c0_15 = arith.constant 0 : index
    %c0_16 = arith.constant 0 : index
    %17 = vector.load %arg8[%c0_15, %c0_16] : memref<1x32xf32, #tpu.memory_space<vmem>>, vector<1x32xf32>
    %cst_17 = arith.constant dense<0.000000e+00> : vector<1x256xf32>
    %18 = tpu.matmul %17, %16, %cst_17 {dimension_numbers = #tpu.dot_dimension_numbers<[1], [0], [0], [1], [0, 0, 1, 1], [], []>} : vector<1x32xf32>, vector<32x256xf32>, vector<1x256xf32> -> vector<1x256xf32>
    %c0_18 = arith.constant 0 : index
    %c0_19 = arith.constant 0 : index
    %19 = vector.load %arg9[%c0_18, %c0_19] : memref<1x1xf32, #tpu.memory_space<vmem>>, vector<1x1xf32>
    %20 = vector.broadcast %19 : vector<1x1xf32> to vector<1x256xf32>
    %21 = arith.addf %18, %20 : vector<1x256xf32>
    %22 = arith.negf %21 : vector<1x256xf32>
    %23 = math.exp %22 : vector<1x256xf32>
    %cst_20 = arith.constant 1.000000e+00 : f32
    %24 = vector.broadcast %cst_20 : f32 to vector<1x256xf32>
    %25 = arith.addf %24, %23 : vector<1x256xf32>
    %26 = arith.divf %24, %25 : vector<1x256xf32>
    %27 = vector.broadcast %26 : vector<1x256xf32> to vector<64x256xf32>
    %28 = arith.mulf %3, %27 : vector<64x256xf32>
    %cst_21 = arith.constant 2.000000e+00 : f32
    %29 = vector.broadcast %cst_21 : f32 to vector<64x256xf32>
    %30 = arith.mulf %28, %29 : vector<64x256xf32>
    %c0_22 = arith.constant 0 : index
    %c0_23 = arith.constant 0 : index
    %c0_24 = arith.constant 0 : index
    %31 = vector.load %arg10[%c0_22, %c0_23, %c0_24] : memref<1x64x256xf32, #tpu.memory_space<vmem>>, vector<1x64x256xf32>
    %32 = vector.shape_cast %31 : vector<1x64x256xf32> to vector<64x256xf32>
    %33 = vector.shape_cast %30 : vector<64x256xf32> to vector<1x64x256xf32>
    tpu.vector_store %arg10[%c0_22, %c0_23, %c0_24], %33 {strides = array<i32>} : memref<1x64x256xf32, #tpu.memory_space<vmem>>, vector<1x64x256xf32>,
    return
  }
  func.func @transform_0(%arg0: i32, %arg1: i32) -> (i32, i32, i32) {
    %c0_i32 = arith.constant 0 : i32
    %c0_i32_0 = arith.constant 0 : i32
    return %arg0, %c0_i32, %arg1 : i32, i32, i32
  }
  func.func @transform_1(%arg0: i32, %arg1: i32) -> (i32, i32, i32) {
    %c0_i32 = arith.constant 0 : i32
    %c0_i32_0 = arith.constant 0 : i32
    return %arg0, %c0_i32, %arg1 : i32, i32, i32
  }
  func.func @transform_2(%arg0: i32, %arg1: i32) -> (i32, i32) {
    %c0_i32 = arith.constant 0 : i32
    %c0_i32_0 = arith.constant 0 : i32
    %c0_i32_1 = arith.constant 0 : i32
    return %c0_i32, %c0_i32_0 : i32, i32
  }
  func.func @transform_3(%arg0: i32, %arg1: i32) -> (i32, i32) {
    %c0_i32 = arith.constant 0 : i32
    %c0_i32_0 = arith.constant 0 : i32
    %c0_i32_1 = arith.constant 0 : i32
    return %c0_i32, %c0_i32_0 : i32, i32
  }
  func.func @transform_4(%arg0: i32, %arg1: i32) -> (i32, i32) {
    %c0_i32 = arith.constant 0 : i32
    %c0_i32_0 = arith.constant 0 : i32
    %c0_i32_1 = arith.constant 0 : i32
    return %c0_i32, %c0_i32_0 : i32, i32
  }
  func.func @transform_5(%arg0: i32, %arg1: i32) -> (i32, i32) {
    %c0_i32 = arith.constant 0 : i32
    %c0_i32_0 = arith.constant 0 : i32
    %c0_i32_1 = arith.constant 0 : i32
    return %c0_i32, %c0_i32_0 : i32, i32
  }
  func.func @transform_6(%arg0: i32, %arg1: i32) -> (i32, i32) {
    %c0_i32 = arith.constant 0 : i32
    %c0_i32_0 = arith.constant 0 : i32
    %c0_i32_1 = arith.constant 0 : i32
    return %c0_i32, %c0_i32_0 : i32, i32
  }
  func.func @transform_7(%arg0: i32, %arg1: i32) -> (i32, i32) {
    %c0_i32 = arith.constant 0 : i32
    %c0_i32_0 = arith.constant 0 : i32
    %c0_i32_1 = arith.constant 0 : i32
    return %c0_i32, %c0_i32_0 : i32, i32
  }
  func.func @transform_8(%arg0: i32, %arg1: i32) -> (i32, i32, i32) {
    %c0_i32 = arith.constant 0 : i32
    %c0_i32_0 = arith.constant 0 : i32
    return %arg0, %c0_i32, %arg1 : i32, i32, i32
  }
}

</mosaic_0001>

<bundles_post_ra>
// kernel: attention_block.1
= control target key start
LH: loop header
LB: loop body
LE: loop exit
PB: predicated region body
PF: predicated region fallthrough
CT: control target
= control target key end

     0   :  { %s1086_s29 = smov 0   ;;  %s1088_s30 = smov 0   ;;  %s1313_s0 = inlined_call_operand.vmem [shape: f32[2,64,256], index: 0, kind: input, shape index: {}]   ;;  %s1314_s1 = inlined_call_operand.vmem [shape: f32[2,64,256], index: 1, kind: input, shape index: {}]   ;;  %s1315_s2 = inlined_call_operand.vmem [shape: f32[32,64], index: 2, kind: input, shape index: {}]   ;;  %s1316_s3 = inlined_call_operand.vmem [shape: f32[32,1], index: 3, kind: input, shape index: {}]   ;;  %s1317_s4 = inlined_call_operand.vmem [shape: f32[32,64], index: 4, kind: input, shape index: {}]   ;;  %s1318_s5 = inlined_call_operand.vmem [shape: f32[32,1], index: 5, kind: input, shape index: {}]   ;;  %s1319_s6 = inlined_call_operand.vmem [shape: f32[1,32], index: 6, kind: input, shape index: {}]   ;;  %s1320_s7 = inlined_call_operand.<no memory space> [shape: f32[1,1], index: 7, kind: input, shape index: {}]   ;;  %s1321_s8 = inlined_call_operand.vmem [shape: f32[2,64,256], index: 8, kind: output, shape index: {}]  }
   0x1   :  { %v13_v0 = vstv %s1320_s7  ;;  %s1090_s9 = smov 0  }
   0x2   :  { %14 = vst [vmem:[#allocation2] sm:$0x1] %v13_v0 }
   0x3 LB: > { %s32_s7 = sadd.s32 1, %s1030_s30  ;;  %p953_p0 = scmp.ge.s32.totalorder %s1034_s9, 1  ;;  %s1034_s9 = sphi %s1090_s9, %s20_s9   ;;  %s1030_s30 = sphi %s1088_s30, %s1323_s30   ;;  %s1026_s29 = sphi %s1086_s29, %s1322_s29  }
   0x4   : > { %p34_p1 = scmp.ge.s32.totalorder %s32_s7, 2  ;;  %p302_p2 = scmp.lt.s32.totalorder %s1034_s9, 3 }
   0x6   : > { %s1325_s7 = smov (%p34_p1, %s32_s7), 0  ;;  %p303_p3 = pnand %p953_p0, %p302_p2 }
   0x7   : > { %p354_p4 = scmp.lt.s32.totalorder (!%p303_p3), %s1026_s29, 1 }
   0x8   : > { %306 = sbr.rel (%p303_p3) target bundleno = 498 (0x1f2), region = 52 }
   0xd   : > { %v1036_v1 = vmov 0.0   ;;  %s1327_s29 = smov (!%p354_p4, %s1026_s29), 1  ;;  %v1037_v2 = vmov 0   ;;  %v422_v3 = vld [vmem:[%s1316_s3 + $0x18] sm:$0xff]  ;;  %v421_v4 = vld [vmem:[%s1316_s3 + $0x10] sm:$0xff]  ;;  %v415_v38 = vld [vmem:[%s1315_s2] sm:$0xff] }
   0xe   : > { %520 = vmatprep.mubr.f32.mxu0 %v1036_v1  ;;  %649 = vmatprep.mubr.f32.mxu1 %v1036_v1  ;;  %s1112_s14 = sshll.u32 %s1327_s29, 7  ;;  %v552_v5 = vld [vmem:[%s1318_s5 + $0x18] sm:$0xff]  ;;  %vm443_vm0 = vcmask 523264   ;;  %v545_v39 = vld [vmem:[%s1317_s4] sm:$0xff]  ;;  %v551_v40 = vld [vmem:[%s1318_s5 + $0x10] sm:$0xff]  ;;  %vm701_vm1 = vcmask 261120  }
   0xf   : > { %1003 = vset.pattern.permute.xlu1 %v1037_v2  ;;  %1002 = vset.pattern.permute.xlu0 %v1037_v2  ;;  %s1121_s19 = scalar_lea.vmem %s1313_s0, %s1112_s14  ;;  %s1128_s22 = scalar_lea.vmem %s1314_s1, %s1112_s14  ;;  %v420_v41 = vld [vmem:[%s1316_s3 + $0x8] sm:$0xff]  ;;  %v419_v45 = vld [vmem:[%s1316_s3] sm:$0xff]  ;;  %v417_v46 = vld [vmem:[%s1315_s2 + $0x10] sm:$0xff] }
  0x10   : > { %440 = vperm.xlu0 %1002, %v422_v3   ;;  %435 = vperm.xlu1 %1003, %v421_v4   ;;  %v398_v6 = vld [vmem:[%s1121_s19 + $0x78] sm:$0xff]  ;;  %v397_v7 = vld [vmem:[%s1121_s19 + $0x70] sm:$0xff]  ;;  %v396_v8 = vld [vmem:[%s1121_s19 + $0x68] sm:$0xff]  ;;  %s1274_s15 = scalar_lea.vmem %s1321_s8, %s1112_s14 }
  0x11   : > { %472 = vmatprep.subr.mxu0 %v398_v6  ;;  %v1133_v9 = vld [vmem:[%s1128_s22 + $0x78] sm:$0xff]  ;;  %v1136_v10 = vld [vmem:[%s1128_s22 + $0x70] sm:$0xff]  ;;  %v1139_v11 = vld [vmem:[%s1128_s22 + $0x68] sm:$0xff] }
  0x12   : > { %601 = vmatprep.subr.mxu1 %v1133_v9  ;;  %473 = vmatpush1.msra.mxu0 %v397_v7  ;;  %v395_v12 = vld [vmem:[%s1121_s19 + $0x60] sm:$0xff]  ;;  %v394_v14 = vld [vmem:[%s1121_s19 + $0x58] sm:$0xff]  ;;  %v393_v16 = vld [vmem:[%s1121_s19 + $0x50] sm:$0xff] }
  0x13   : > { %v1144_v13 = vld [vmem:[%s1128_s22 + $0x60] sm:$0xff]  ;;  %602 = vmatpush1.msra.mxu1 %v1136_v10  ;;  %474 = vmatprep.subr.mxu0 %v396_v8  ;;  %v1149_v15 = vld [vmem:[%s1128_s22 + $0x58] sm:$0xff]  ;;  %v1154_v17 = vld [vmem:[%s1128_s22 + $0x50] sm:$0xff] }
  0x14   : > { %570 = vperm.xlu0 %1002, %v552_v5   ;;  %603 = vmatprep.subr.mxu1 %v1139_v11  ;;  %v392_v18 = vld [vmem:[%s1121_s19 + $0x48] sm:$0xff]  ;;  %v391_v20 = vld [vmem:[%s1121_s19 + $0x40] sm:$0xff]  ;;  %v390_v22 = vld [vmem:[%s1121_s19 + $0x38] sm:$0xff] }
  0x15   : > { %475 = vmatpush1.msra.mxu0 %v395_v12  ;;  %604 = vmatpush1.msra.mxu1 %v1144_v13  ;;  %v1159_v19 = vld [vmem:[%s1128_s22 + $0x48] sm:$0xff]  ;;  %v1164_v21 = vld [vmem:[%s1128_s22 + $0x40] sm:$0xff]  ;;  %v1169_v23 = vld [vmem:[%s1128_s22 + $0x38] sm:$0xff] }
  0x16   : > { %476 = vmatprep.subr.mxu0 %v394_v14  ;;  %605 = vmatprep.subr.mxu1 %v1149_v15  ;;  %v389_v24 = vld [vmem:[%s1121_s19 + $0x30] sm:$0xff]  ;;  %v388_v26 = vld [vmem:[%s1121_s19 + $0x28] sm:$0xff]  ;;  %v387_v28 = vld [vmem:[%s1121_s19 + $0x20] sm:$0xff] }
  0x17   : > { %477 = vmatpush1.msra.mxu0 %v393_v16  ;;  %606 = vmatpush1.msra.mxu1 %v1154_v17  ;;  %v1174_v25 = vld [vmem:[%s1128_s22 + $0x30] sm:$0xff]  ;;  %v1179_v27 = vld [vmem:[%s1128_s22 + $0x28] sm:$0xff]  ;;  %v1184_v29 = vld [vmem:[%s1128_s22 + $0x20] sm:$0xff] }
  0x18   : > { %478 = vmatprep.subr.mxu0 %v392_v18  ;;  %607 = vmatprep.subr.mxu1 %v1159_v19  ;;  %v386_v30 = vld [vmem:[%s1121_s19 + $0x18] sm:$0xff]  ;;  %v385_v32 = vld [vmem:[%s1121_s19 + $0x10] sm:$0xff]  ;;  %v384_v34 = vld [vmem:[%s1121_s19 + $0x8] sm:$0xff] }
  0x19   : > { %479 = vmatpush1.msra.mxu0 %v391_v20  ;;  %608 = vmatpush1.msra.mxu1 %v1164_v21  ;;  %v1189_v31 = vld [vmem:[%s1128_s22 + $0x18] sm:$0xff]  ;;  %v1194_v33 = vld [vmem:[%s1128_s22 + $0x10] sm:$0xff]  ;;  %v1199_v35 = vld [vmem:[%s1128_s22 + $0x8] sm:$0xff] }
  0x1a   : > { %480 = vmatprep.subr.mxu0 %v390_v22  ;;  %609 = vmatprep.subr.mxu1 %v1169_v23  ;;  %v383_v36 = vld [vmem:[%s1121_s19] sm:$0xff]  ;;  %v416_v42 = vld [vmem:[%s1315_s2 + $0x8] sm:$0xff]  ;;  %v547_v47 = vld [vmem:[%s1317_s4 + $0x10] sm:$0xff] }
  0x1b   : > { %481 = vmatpush1.msra.mxu0 %v389_v24  ;;  %610 = vmatpush1.msra.mxu1 %v1174_v25  ;;  %v1204_v37 = vld [vmem:[%s1128_s22] sm:$0xff]  ;;  %v546_v43 = vld [vmem:[%s1317_s4 + $0x8] sm:$0xff]  ;;  %v418_v50 = vld [vmem:[%s1315_s2 + $0x18] sm:$0xff] }
  0x1c   : > { %482 = vmatprep.subr.mxu0 %v388_v26  ;;  %611 = vmatprep.subr.mxu1 %v1179_v27  ;;  %v550_v44 = vld [vmem:[%s1318_s5 + $0x8] sm:$0xff]  ;;  %v549_v48 = vld [vmem:[%s1318_s5] sm:$0xff]  ;;  %v548_v51 = vld [vmem:[%s1317_s4 + $0x18] sm:$0xff] }
  0x1d   : > { %483 = vmatpush1.msra.mxu0 %v387_v28  ;;  %612 = vmatpush1.msra.mxu1 %v1184_v29  ;;  %v691_v49 = vld [vmem:[#allocation2] sm:$0x1] }
  0x1e   : > { %484 = vmatprep.subr.mxu0 %v386_v30  ;;  %613 = vmatprep.subr.mxu1 %v1189_v31 }
  0x1f   : > { %485 = vmatpush1.msra.mxu0 %v385_v32  ;;  %614 = vmatpush1.msra.mxu1 %v1194_v33 }
  0x20   : > { %486 = vmatprep.subr.mxu0 %v384_v34  ;;  %615 = vmatprep.subr.mxu1 %v1199_v35 }
  0x21   : > { %487 = vmatpush1.msra.mxu0 %v383_v36  ;;  %616 = vmatpush1.msra.mxu1 %v1204_v37 }
  0x22   : > { %960 = vmatmul.mubr.msk.f32.vlgmr.msra.gmra.mxu0 %vm443_vm0, %v415_v38  ;;  %964 = vmatmul.mubr.msk.f32.vlgmr.msra.gmra.mxu1 %vm443_vm0, %v545_v39 }
  0x23   : > { %526 = vmatprep.mubr.f32.mxu0 %v1036_v1  ;;  %655 = vmatprep.mubr.f32.mxu1 %v1036_v1 }
  0x24   : > { %565 = vperm.xlu1 %1003, %v551_v40   ;;  %430 = vperm.xlu0 %1002, %v420_v41  }
  0x26   : > { %961 = vmatmul.mubr.msk.f32.gmra.mxu0 %vm443_vm0, %v416_v42  ;;  %965 = vmatmul.mubr.msk.f32.gmra.mxu1 %vm443_vm0, %v546_v43 }
  0x27   : > { %532 = vmatprep.mubr.f32.mxu0 %v1036_v1  ;;  %661 = vmatprep.mubr.f32.mxu1 %v1036_v1 }
  0x28   : > { %560 = vperm.xlu1 %1003, %v550_v44   ;;  %425 = vperm.xlu0 %1002, %v419_v45  }
  0x2a   : > { %962 = vmatmul.mubr.msk.f32.gmra.mxu0 %vm443_vm0, %v417_v46  ;;  %966 = vmatmul.mubr.msk.f32.gmra.mxu1 %vm443_vm0, %v547_v47 }
  0x2b   : > { %538 = vmatprep.mubr.f32.mxu0 %v1036_v1  ;;  %667 = vmatprep.mubr.f32.mxu1 %v1036_v1 }
  0x2c   : > { %555 = vperm.xlu1 %1003, %v549_v48   ;;  %694 = vperm.xlu0 %1002, %v691_v49  }
  0x2e   : > { %963 = vmatmul.mubr.msk.f32.gmra.mxu0 %vm443_vm0, %v418_v50  ;;  %967 = vmatmul.mubr.msk.f32.gmra.mxu1 %vm443_vm0, %v548_v51 }
  0x2f   : > { %769 = vmatprep.mubr.f32.mxu0 %v1036_v1 }
  0x8b   : > { %v441_v52 = vpop.permute.xlu0 %440  ;;  %v436_v53 = vpop.permute.xlu1 %435 }
  0x8f   : > { %v571_v57 = vpop.permute.xlu0 %570 }
  0x9f   : > { %v566_v59 = vpop.permute.xlu1 %565  ;;  %v431_v2 = vpop.permute.xlu0 %430 }
  0xa3   : > { %v561_v4 = vpop.permute.xlu1 %560  ;;  %v426_v30 = vpop.permute.xlu0 %425 }
  0xa7   : > { %v556_v28 = vpop.permute.xlu1 %555 }
  0xe2   : > { %v522_v54 = vpop.f32.mrf.mxu0  ;;  %v651_v55 = vpop.f32.mrf.mxu1 }
  0xe3   : > { %v523_v45 = vadd.f32 %v522_v54, %v426_v30  ;;  %v652_v46 = vadd.f32 %v651_v55, %v556_v28  ;;  %v690_v54 = vld [vmem:[%s1319_s6] sm:$0x1]  ;;  %v697_v55 = vlaneseq }
  0xe4   : > { %v524_v56 = vpop.f32.mrf.mxu0  ;;  %v653_v58 = vpop.f32.mrf.mxu1 }
  0xe5   : > { %v525_v41 = vadd.f32 %v524_v56, %v426_v30  ;;  %v654_v42 = vadd.f32 %v653_v58, %v556_v28 }
  0xe6   : > { %v528_v60 = vpop.f32.mrf.mxu0  ;;  %v657_v61 = vpop.f32.mrf.mxu1 }
  0xe7   : > { %v529_v38 = vadd.f32 %v528_v60, %v431_v2  ;;  %v658_v39 = vadd.f32 %v657_v61, %v561_v4  ;;  %v698_v61 = vshrl.u32 %v697_v55, 7 }
  0xe8   : > { %v530_v62 = vpop.f32.mrf.mxu0  ;;  %v659_v63 = vpop.f32.mrf.mxu1 }
  0xe9   : > { %v531_v32 = vadd.f32 %v530_v62, %v431_v2  ;;  %v660_v34 = vadd.f32 %v659_v63, %v561_v4  ;;  %v676_v50 = vadd.f32 %v658_v39, %v529_v38  ;;  %v699_v63 = vsub.s32 0, %v698_v61 }
  0xea   : > { %v534_v0 = vpop.f32.mrf.mxu0  ;;  %v663_v3 = vpop.f32.mrf.mxu1 }
  0xeb   : > { %v535_v20 = vadd.f32 %v534_v0, %v436_v53  ;;  %v664_v22 = vadd.f32 %v663_v3, %v566_v59  ;;  %v677_v48 = vadd.f32 %v660_v34, %v531_v32  ;;  %v684_v60 = vmax.f32 %v676_v50, 0.0  ;;  %v695_v0 = vpop.permute.xlu0 %694 }
  0xec   : > { %v536_v5 = vpop.f32.mrf.mxu0  ;;  %v665_v6 = vpop.f32.mrf.mxu1  ;;  %v700_v2 = vrot.slane %v695_v0, %v699_v63 }
  0xed   : > { %v537_v12 = vadd.f32 %v536_v5, %v436_v53  ;;  %v666_v14 = vadd.f32 %v665_v6, %v566_v59  ;;  %v678_v47 = vadd.f32 %v664_v22, %v535_v20  ;;  %v674_v59 = vadd.f32 %v652_v46, %v523_v45 }
  0xee   : > { %v540_v7 = vpop.f32.mrf.mxu0  ;;  %v669_v8 = vpop.f32.mrf.mxu1 }
  0xef   : > { %v541_v1 = vadd.f32 %v540_v7, %v441_v52  ;;  %v670_v16 = vadd.f32 %v669_v8, %v571_v57  ;;  %v679_v43 = vadd.f32 %v666_v14, %v537_v12  ;;  %v686_v62 = vmax.f32 %v678_v47, 0.0 }
  0xf0   : > { %v542_v18 = vpop.f32.mrf.mxu0  ;;  %v671_v26 = vpop.f32.mrf.mxu1  ;;  %v682_v58 = vmax.f32 %v674_v59, 0.0 }
  0xf1   : > { %v543_v24 = vadd.f32 %v542_v18, %v441_v52  ;;  %v672_v36 = vadd.f32 %v671_v26, %v571_v57  ;;  %v680_v40 = vadd.f32 %v670_v16, %v541_v1  ;;  %v675_v52 = vadd.f32 %v654_v42, %v525_v41 }
  0xf2   : > { %v687_v53 = vmax.f32 %v679_v43, 0.0  ;;  %v685_v57 = vmax.f32 %v677_v48, 0.0 }
  0xf3   : > { %v681_v44 = vadd.f32 %v672_v36, %v543_v24  ;;  %v688_v51 = vmax.f32 %v680_v40, 0.0  ;;  %v683_v56 = vmax.f32 %v675_v52, 0.0 }
  0xf5   : > { %v689_v49 = vmax.f32 %v681_v44, 0.0 }
  0xf7   : > { %729 = vmatprep.subr.mxu0 %v689_v49 }
  0xf8   : > { %730 = vmatpush1.msra.mxu0 %v688_v51 }
  0xf9   : > { %731 = vmatprep.subr.mxu0 %v687_v53 }
  0xfa   : > { %732 = vmatpush1.msra.mxu0 %v686_v62 }
  0xfb   : > { %733 = vmatprep.subr.mxu0 %v685_v57 }
  0xfc   : > { %734 = vmatpush1.msra.mxu0 %v684_v60 }
  0xfd   : > { %735 = vmatprep.subr.mxu0 %v683_v56 }
  0xfe   : > { %736 = vmatpush1.msra.mxu0 %v682_v58 }
  0xff   : > { %968 = vmatmul.mubr.msk.f32.vlgmr.msra.gmra.mxu0 %vm701_vm1, %v690_v54 }
 0x1bf   : > { %v771_v3 = vpop.f32.mrf.mxu0 }
 0x1c0   : > { %v772_v4 = vadd.f32 %v771_v3, %v700_v2 }
 0x1c1   : > { %v773_v5 = vpop.f32.mrf.mxu0 }
 0x1c2   : > { %v969_v6 = vmul.f32 -1.442695, %v772_v4  ;;  %v774_v7 = vadd.f32 %v773_v5, %v700_v2 }
 0x1c4   : > { %1004 = vpow2.f32 %v969_v6  ;;  %v970_v1 = vmul.f32 -1.442695, %v774_v7 }
 0x1c6   : > { %1006 = vpow2.f32 %v970_v1 }
 0x1d1   : > { %v1005_v8 = vpop.eup %1004 }
 0x1d2   : > { %v782_v12 = vadd.f32 1.0, %v1005_v8 }
 0x1d3   : > { %v1007_v14 = vpop.eup %1006 }
 0x1d4   : > { %1008 = vrcp.f32 %v782_v12  ;;  %v783_v16 = vadd.f32 1.0, %v1007_v14 }
 0x1d6   : > { %1010 = vrcp.f32 %v783_v16 }
 0x1e1   : > { %v1009_v18 = vpop.eup %1008 }
 0x1e2   : > { %v791_v20 = vrot.slane %v1009_v18, %v699_v63 }
 0x1e3   : > { %v1011_v30 = vpop.eup %1010 }
 0x1e4   : > { %v796_v22 = vmul.f32 %v791_v20, %v1204_v37  ;;  %v798_v24 = vmul.f32 %v791_v20, %v1194_v33  ;;  %v800_v26 = vmul.f32 %v791_v20, %v1184_v29  ;;  %v802_v28 = vmul.f32 %v791_v20, %v1174_v25 }
 0x1e5   : > { %v804_v32 = vmul.f32 %v791_v20, %v1164_v21  ;;  %v806_v37 = vmul.f32 %v791_v20, %v1154_v17  ;;  %v808_v33 = vmul.f32 %v791_v20, %v1144_v13  ;;  %v810_v25 = vmul.f32 %v791_v20, %v1136_v10 }
 0x1e6   : > { %v812_v29 = vmul.f32 2.0, %v796_v22  ;;  %v814_v34 = vmul.f32 2.0, %v798_v24  ;;  %v816_v36 = vmul.f32 2.0, %v800_v26  ;;  %v818_v38 = vmul.f32 2.0, %v802_v28 }
 0x1e7   : > { %v820_v39 = vmul.f32 2.0, %v804_v32  ;;  %v822_v40 = vmul.f32 2.0, %v806_v37  ;;  %v824_v41 = vmul.f32 2.0, %v808_v33  ;;  %v826_v42 = vmul.f32 2.0, %v810_v25 }
 0x1e8   : > { %828 = vst [vmem:[%s1274_s15] sm:$0xff] %v812_v29  ;;  %830 = vst [vmem:[%s1274_s15 + $0x10] sm:$0xff] %v814_v34  ;;  %v795_v17 = vrot.slane %v1011_v30, %v699_v63 }
 0x1e9   : > { %832 = vst [vmem:[%s1274_s15 + $0x20] sm:$0xff] %v816_v36  ;;  %834 = vst [vmem:[%s1274_s15 + $0x30] sm:$0xff] %v818_v38 }
 0x1ea   : > { %836 = vst [vmem:[%s1274_s15 + $0x40] sm:$0xff] %v820_v39  ;;  %838 = vst [vmem:[%s1274_s15 + $0x50] sm:$0xff] %v822_v40  ;;  %v797_v10 = vmul.f32 %v795_v17, %v1199_v35  ;;  %v799_v13 = vmul.f32 %v795_v17, %v1189_v31  ;;  %v801_v21 = vmul.f32 %v795_v17, %v1179_v27 }
 0x1eb   : > { %840 = vst [vmem:[%s1274_s15 + $0x60] sm:$0xff] %v824_v41  ;;  %842 = vst [vmem:[%s1274_s15 + $0x70] sm:$0xff] %v826_v42  ;;  %v803_v43 = vmul.f32 %v795_v17, %v1169_v23  ;;  %v805_v44 = vmul.f32 %v795_v17, %v1159_v19  ;;  %v807_v45 = vmul.f32 %v795_v17, %v1149_v15 }
 0x1ec   : > { %v809_v46 = vmul.f32 %v795_v17, %v1139_v11  ;;  %v811_v35 = vmul.f32 %v795_v17, %v1133_v9  ;;  %v813_v31 = vmul.f32 2.0, %v797_v10  ;;  %v815_v47 = vmul.f32 2.0, %v799_v13 }
 0x1ed   : > { %v817_v48 = vmul.f32 2.0, %v801_v21  ;;  %v819_v27 = vmul.f32 2.0, %v803_v43  ;;  %v821_v49 = vmul.f32 2.0, %v805_v44  ;;  %v823_v50 = vmul.f32 2.0, %v807_v45 }
 0x1ee   : > { %v825_v23 = vmul.f32 2.0, %v809_v46  ;;  %v827_v51 = vmul.f32 2.0, %v811_v35  ;;  %829 = vst [vmem:[%s1274_s15 + $0x8] sm:$0xff] %v813_v31  ;;  %831 = vst [vmem:[%s1274_s15 + $0x18] sm:$0xff] %v815_v47 }
 0x1ef   : > { %833 = vst [vmem:[%s1274_s15 + $0x28] sm:$0xff] %v817_v48  ;;  %835 = vst [vmem:[%s1274_s15 + $0x38] sm:$0xff] %v819_v27 }
 0x1f0   : > { %837 = vst [vmem:[%s1274_s15 + $0x48] sm:$0xff] %v821_v49  ;;  %839 = vst [vmem:[%s1274_s15 + $0x58] sm:$0xff] %v823_v50 }
 0x1f1   : > { %841 = vst [vmem:[%s1274_s15 + $0x68] sm:$0xff] %v825_v23  ;;  %843 = vst [vmem:[%s1274_s15 + $0x78] sm:$0xff] %v827_v51 }
 0x1f2 PF: > { %s20_s9 = sadd.s32 1, %s1034_s9   ;;  %s1322_s29 = smov %s1030_s30 }
 0x1f3   : > { %p17_p5 = scmp.ge.s32.totalorder %s20_s9, 4   ;;  %s1323_s30 = smov %s1325_s7 }
 0x1f5   :  { %19 = sbr.rel (!%p17_p5) target bundleno = 3 (0x3), region = 85 }

</bundles_post_ra>
